<compile_context>
chip_gen: v7x
topology: tpu7x:2x2x1
jax: 0.10.0
libtpu: 0.0.40
codegen_flags: <defaults>
</compile_context>

<pallas_src>
import functools

import jax
import jax.numpy as jnp
from jax.experimental import pallas as pl
from jax.experimental.pallas import tpu as pltpu


# ----------------------------------------------------------------------------- kernel
def _make_server_kernel(num_party):
    """Fused (sum of per-party partial matmuls) + ReLU + Linear + log_softmax."""

    def kernel(*refs):
        # refs = (e_0, ..., e_{P-1}, w1, b1, w2, b2, o)
        embed_refs = refs[:num_party]
        w1_ref, b1_ref, w2_ref, b2_ref, o_ref = refs[num_party:num_party + 5]

        # Layer 1: x @ W1 + b1 computed as an unrolled sum over parties
        # (equivalent to concatenating the embeds along the feature axis).
        acc = jnp.dot(embed_refs[0][...], w1_ref[0],
                      preferred_element_type=jnp.float32)
        for p in range(1, num_party):
            acc = acc + jnp.dot(embed_refs[p][...], w1_ref[p],
                                preferred_element_type=jnp.float32)
        h = jnp.maximum(acc + b1_ref[...], 0.0)

        # Layer 2: Linear (bf16 operands, f32 accumulation)
        logits = jnp.dot(h.astype(jnp.bfloat16), w2_ref[...],
                         preferred_element_type=jnp.float32) + b2_ref[...]

        # log_softmax along dim=1 (last axis), numerically stable, all f32
        m = jnp.max(logits, axis=-1, keepdims=True)
        shifted = logits - m
        lse = jnp.log(jnp.sum(jnp.exp(shifted), axis=-1, keepdims=True))
        o_ref[...] = (shifted - lse).astype(o_ref.dtype)

    return kernel


def _round_up(x, m):
    return (x + m - 1) // m * m


# ----------------------------------------------------------------------------- wrapper
@functools.partial(jax.jit, static_argnames=("block_b",))
def server_forward(embeds, w1, b1, w2, b2, block_b=1024):
    """embeds: list of [B, num_embed] arrays (one per party).

    w1: [F_in, H] (F_in = num_party*num_embed), b1: [1, H] or [H]
    w2: [H, C],                                  b2: [1, C] or [C]
    Returns log-probabilities [B, C] in float32.
    """
    embeds = list(embeds)
    num_party = len(embeds)
    B, num_embed = embeds[0].shape
    H = w1.shape[-1]
    C = w2.shape[-1]

    # bf16 activations/weights (MXU inputs); biases stay f32.
    embeds = [e.astype(jnp.bfloat16) for e in embeds]
    w1_p = w1.astype(jnp.bfloat16).reshape(num_party, num_embed, H)
    w2_b = w2.astype(jnp.bfloat16)
    b1_f = b1.astype(jnp.float32).reshape(1, H)
    b2_f = b2.astype(jnp.float32).reshape(1, C)

    # Batch tiling: biggest useful tile, multiple of 8, pad B up if needed.
    tb = min(block_b, _round_up(B, 8))
    b_pad = _round_up(B, tb)
    if b_pad != B:
        embeds = [jnp.pad(e, ((0, b_pad - B), (0, 0))) for e in embeds]
    grid = (b_pad // tb,)

    embed_specs = [
        pl.BlockSpec((tb, num_embed), lambda i: (i, 0)) for _ in range(num_party)
    ]
    # Constant index maps -> weights/biases stay VMEM-resident across all tiles.
    weight_specs = [
        pl.BlockSpec((num_party, num_embed, H), lambda i: (0, 0, 0)),
        pl.BlockSpec((1, H), lambda i: (0, 0)),
        pl.BlockSpec((H, C), lambda i: (0, 0)),
        pl.BlockSpec((1, C), lambda i: (0, 0)),
    ]

    cost = pl.CostEstimate(
        flops=2 * b_pad * (num_party * num_embed * H + H * C),
        transcendentals=b_pad * (C + 1),
        bytes_accessed=(
            b_pad * num_party * num_embed * 2      # bf16 embeds in
            + b_pad * C * 4                        # f32 log-probs out
            + (num_party * num_embed * H + H * C) * 2  # bf16 weights
            + (H + C) * 4                          # f32 biases
        ),
    )

    out = pl.pallas_call(
        _make_server_kernel(num_party),
        out_shape=jax.ShapeDtypeStruct((b_pad, C), jnp.float32),
        grid_spec=pltpu.PrefetchScalarGridSpec(
            num_scalar_prefetch=0,
            grid=grid,
            in_specs=embed_specs + weight_specs,
            out_specs=pl.BlockSpec((tb, C), lambda i: (i, 0)),
        ),
        compiler_params=pltpu.CompilerParams(
            dimension_semantics=("parallel",),   # shard batch tiles across TCs on v7x
        ),
        cost_estimate=cost,
    )(*embeds, w1_p, b1_f, w2_b, b2_f)

    return out[:B]


# ----------------------------------------------------------------------------- params
def init_server_params(key, num_party, num_embed, num_classes, num_layer=2, hidden=128):
    """PyTorch nn.Linear-style init (U(-1/sqrt(in), 1/sqrt(in))), weights as [in, out]."""
    assert num_layer == 2, "this synthetic script instantiates the num_layer=2 branch"
    f_in = num_party * num_embed
    k1, k2, k3, k4 = jax.random.split(key, 4)

    bound1 = 1.0 / jnp.sqrt(f_in)
    w1 = jax.random.uniform(k1, (f_in, hidden), jnp.float32, -bound1, bound1)
    b1 = jax.random.uniform(k2, (1, hidden), jnp.float32, -bound1, bound1)

    bound2 = 1.0 / jnp.sqrt(hidden)
    w2 = jax.random.uniform(k3, (hidden, num_classes), jnp.float32, -bound2, bound2)
    b2 = jax.random.uniform(k4, (1, num_classes), jnp.float32, -bound2, bound2)
    return w1, b1, w2, b2


# ----------------------------------------------------------------------------- main
if __name__ == "__main__":
    num_party = 2
    num_embed = 16
    num_classes = 10
    num_layer = 2
    batch = 8

    key = jax.random.PRNGKey(0)
    kp, ke = jax.random.split(key)
    w1, b1, w2, b2 = init_server_params(kp, num_party, num_embed, num_classes, num_layer)

    ekeys = jax.random.split(ke, num_party)
    embeds = [
        jax.random.normal(ekeys[i], (batch, num_embed), jnp.float32)
        for i in range(num_party)
    ]

    out = server_forward(embeds, w1, b1, w2, b2)
    out = jax.block_until_ready(out)
    assert out.shape == (batch, num_classes)

    # Reference 1: exact f32 semantics of the PyTorch module (loose tol, bf16 inputs).
    x = jnp.concatenate(embeds, axis=1)
    h = jnp.maximum(x @ w1 + b1, 0.0)
    ref_f32 = jax.nn.log_softmax(h @ w2 + b2, axis=1)
    assert jnp.allclose(out, ref_f32, atol=3e-2, rtol=3e-2), "mismatch vs f32 reference"

    # Reference 2: matches the kernel's bf16-operand / f32-accumulate arithmetic (tight tol).
    xb = x.astype(jnp.bfloat16)
    hb = jnp.maximum(
        jnp.dot(xb, w1.astype(jnp.bfloat16), preferred_element_type=jnp.float32) + b1, 0.0)
    logits_b = jnp.dot(hb.astype(jnp.bfloat16), w2.astype(jnp.bfloat16),
                       preferred_element_type=jnp.float32) + b2
    ref_bf16 = jax.nn.log_softmax(logits_b, axis=1)
    assert jnp.allclose(out, ref_bf16, atol=1e-4, rtol=1e-4), "mismatch vs bf16 reference"

    print("KERNEL_OK")
</pallas_src>

<mosaic_0001>
module attributes {stable_mosaic.version = 11 : i64} {
  func.func @kernel(%arg0: i32, %arg1: memref<8x16xbf16, #tpu.memory_space<vmem>>, %arg2: memref<8x16xbf16, #tpu.memory_space<vmem>>, %arg3: memref<2x16x128xbf16, #tpu.memory_space<vmem>>, %arg4: memref<1x128xf32, #tpu.memory_space<vmem>>, %arg5: memref<128x10xbf16, #tpu.memory_space<vmem>>, %arg6: memref<1x10xf32, #tpu.memory_space<vmem>>, %arg7: memref<8x10xf32, #tpu.memory_space<vmem>>) attributes {dimension_semantics = [#tpu.dimension_semantics<parallel>], iteration_bounds = array<i64: 1>, scalar_prefetch = 0 : i64, scratch_operands = 0 : i64, tpu.core_type = #tpu.core_type<tc>, window_params = [{transform_indices = @transform_0, window_bounds = array<i64: 8, 16>}, {transform_indices = @transform_1, window_bounds = array<i64: 8, 16>}, {pipeline_mode = #tpu.pipeline_mode<synchronous>, transform_indices = @transform_2, window_bounds = array<i64: 2, 16, 128>}, {pipeline_mode = #tpu.pipeline_mode<synchronous>, transform_indices = @transform_3, window_bounds = array<i64: 1, 128>}, {pipeline_mode = #tpu.pipeline_mode<synchronous>, transform_indices = @transform_4, window_bounds = array<i64: 128, 10>}, {pipeline_mode = #tpu.pipeline_mode<synchronous>, transform_indices = @transform_5, window_bounds = array<i64: 1, 10>}, {transform_indices = @transform_6, window_bounds = array<i64: 8, 10>}]} {
    %c0 = arith.constant 0 : index
    %c0_0 = arith.constant 0 : index
    %0 = vector.load %arg1[%c0, %c0_0] : memref<8x16xbf16, #tpu.memory_space<vmem>>, vector<8x16xbf16>
    %c0_1 = arith.constant 0 : index
    %c0_2 = arith.constant 0 : index
    %c0_3 = arith.constant 0 : index
    %1 = vector.load %arg3[%c0_1, %c0_2, %c0_3] : memref<2x16x128xbf16, #tpu.memory_space<vmem>>, vector<1x16x128xbf16>
    %2 = vector.shape_cast %1 : vector<1x16x128xbf16> to vector<16x128xbf16>
    %cst = arith.constant dense<0.000000e+00> : vector<8x128xf32>
    %3 = tpu.matmul %0, %2, %cst {dimension_numbers = #tpu.dot_dimension_numbers<[1], [0], [0], [1], [0, 0, 1, 1], [], []>} : vector<8x16xbf16>, vector<16x128xbf16>, vector<8x128xf32> -> vector<8x128xf32>
    %c0_4 = arith.constant 0 : index
    %c0_5 = arith.constant 0 : index
    %4 = vector.load %arg2[%c0_4, %c0_5] : memref<8x16xbf16, #tpu.memory_space<vmem>>, vector<8x16xbf16>
    %c1 = arith.constant 1 : index
    %c0_6 = arith.constant 0 : index
    %c0_7 = arith.constant 0 : index
    %5 = vector.load %arg3[%c1, %c0_6, %c0_7] : memref<2x16x128xbf16, #tpu.memory_space<vmem>>, vector<1x16x128xbf16>
    %6 = vector.shape_cast %5 : vector<1x16x128xbf16> to vector<16x128xbf16>
    %cst_8 = arith.constant dense<0.000000e+00> : vector<8x128xf32>
    %7 = tpu.matmul %4, %6, %cst_8 {dimension_numbers = #tpu.dot_dimension_numbers<[1], [0], [0], [1], [0, 0, 1, 1], [], []>} : vector<8x16xbf16>, vector<16x128xbf16>, vector<8x128xf32> -> vector<8x128xf32>
    %8 = arith.addf %3, %7 : vector<8x128xf32>
    %c0_9 = arith.constant 0 : index
    %c0_10 = arith.constant 0 : index
    %9 = vector.load %arg4[%c0_9, %c0_10] : memref<1x128xf32, #tpu.memory_space<vmem>>, vector<1x128xf32>
    %10 = vector.broadcast %9 : vector<1x128xf32> to vector<8x128xf32>
    %11 = arith.addf %8, %10 : vector<8x128xf32>
    %cst_11 = arith.constant 0.000000e+00 : f32
    %12 = vector.broadcast %cst_11 : f32 to vector<8x128xf32>
    %13 = arith.maximumf %11, %12 : vector<8x128xf32>
    %14 = arith.truncf %13 : vector<8x128xf32> to vector<8x128xbf16>
    %c0_12 = arith.constant 0 : index
    %c0_13 = arith.constant 0 : index
    %15 = vector.load %arg5[%c0_12, %c0_13] : memref<128x10xbf16, #tpu.memory_space<vmem>>, vector<128x10xbf16>
    %cst_14 = arith.constant dense<0.000000e+00> : vector<8x10xf32>
    %16 = tpu.matmul %14, %15, %cst_14 {dimension_numbers = #tpu.dot_dimension_numbers<[1], [0], [0], [1], [0, 0, 1, 1], [], []>} : vector<8x128xbf16>, vector<128x10xbf16>, vector<8x10xf32> -> vector<8x10xf32>
    %c0_15 = arith.constant 0 : index
    %c0_16 = arith.constant 0 : index
    %17 = vector.load %arg6[%c0_15, %c0_16] : memref<1x10xf32, #tpu.memory_space<vmem>>, vector<1x10xf32>
    %18 = vector.broadcast %17 : vector<1x10xf32> to vector<8x10xf32>
    %19 = arith.addf %16, %18 : vector<8x10xf32>
    %cst_17 = arith.constant dense<0xFF800000> : vector<8xf32>
    %20 = vector.multi_reduction <maximumf>, %19, %cst_17 [1] : vector<8x10xf32> to vector<8xf32>
    %21 = vector.shape_cast %20 : vector<8xf32> to vector<8x1xf32>
    %22 = vector.broadcast %21 : vector<8x1xf32> to vector<8x10xf32>
    %23 = arith.subf %19, %22 : vector<8x10xf32>
    %24 = math.exp %23 : vector<8x10xf32>
    %cst_18 = arith.constant dense<0.000000e+00> : vector<8xf32>
    %25 = vector.multi_reduction <add>, %24, %cst_18 [1] : vector<8x10xf32> to vector<8xf32>
    %26 = vector.shape_cast %25 : vector<8xf32> to vector<8x1xf32>
    %27 = math.log %26 : vector<8x1xf32>
    %28 = vector.broadcast %27 : vector<8x1xf32> to vector<8x10xf32>
    %29 = arith.subf %23, %28 : vector<8x10xf32>
    %c0_19 = arith.constant 0 : index
    %c0_20 = arith.constant 0 : index
    %30 = vector.load %arg7[%c0_19, %c0_20] : memref<8x10xf32, #tpu.memory_space<vmem>>, vector<8x10xf32>
    tpu.vector_store %arg7[%c0_19, %c0_20], %29 {strides = array<i32>} : memref<8x10xf32, #tpu.memory_space<vmem>>, vector<8x10xf32>,
    return
  }
  func.func @transform_0(%arg0: i32) -> (i32, i32) {
    %c0_i32 = arith.constant 0 : i32
    %c0_i32_0 = arith.constant 0 : i32
    return %arg0, %c0_i32 : i32, i32
  }
  func.func @transform_1(%arg0: i32) -> (i32, i32) {
    %c0_i32 = arith.constant 0 : i32
    %c0_i32_0 = arith.constant 0 : i32
    return %arg0, %c0_i32 : i32, i32
  }
  func.func @transform_2(%arg0: i32) -> (i32, i32, i32) {
    %c0_i32 = arith.constant 0 : i32
    %c0_i32_0 = arith.constant 0 : i32
    %c0_i32_1 = arith.constant 0 : i32
    %c0_i32_2 = arith.constant 0 : i32
    return %c0_i32, %c0_i32_0, %c0_i32_1 : i32, i32, i32
  }
  func.func @transform_3(%arg0: i32) -> (i32, i32) {
    %c0_i32 = arith.constant 0 : i32
    %c0_i32_0 = arith.constant 0 : i32
    %c0_i32_1 = arith.constant 0 : i32
    return %c0_i32, %c0_i32_0 : i32, i32
  }
  func.func @transform_4(%arg0: i32) -> (i32, i32) {
    %c0_i32 = arith.constant 0 : i32
    %c0_i32_0 = arith.constant 0 : i32
    %c0_i32_1 = arith.constant 0 : i32
    return %c0_i32, %c0_i32_0 : i32, i32
  }
  func.func @transform_5(%arg0: i32) -> (i32, i32) {
    %c0_i32 = arith.constant 0 : i32
    %c0_i32_0 = arith.constant 0 : i32
    %c0_i32_1 = arith.constant 0 : i32
    return %c0_i32, %c0_i32_0 : i32, i32
  }
  func.func @transform_6(%arg0: i32) -> (i32, i32) {
    %c0_i32 = arith.constant 0 : i32
    %c0_i32_0 = arith.constant 0 : i32
    return %arg0, %c0_i32 : i32, i32
  }
}

</mosaic_0001>

<bundles_post_ra>
// kernel: server_forward.1
= control target key start
LH: loop header
LB: loop body
LE: loop exit
PB: predicated region body
PF: predicated region fallthrough
CT: control target
= control target key end

     0   :  { %v382_v1 = vmov 0.0   ;;  %vm383_vm0 = vmmov 0   ;;  %vm38_vm1 = vcmask 130048   ;;  %s479_s0 = inlined_call_operand.vmem [shape: bf16[8,16], index: 0, kind: input, shape index: {}]   ;;  %s480_s1 = inlined_call_operand.vmem [shape: bf16[8,16], index: 1, kind: input, shape index: {}]   ;;  %s481_s2 = inlined_call_operand.vmem [shape: bf16[2,16,128], index: 2, kind: input, shape index: {}]   ;;  %s482_s3 = inlined_call_operand.vmem [shape: f32[1,128], index: 3, kind: input, shape index: {}]   ;;  %s483_s4 = inlined_call_operand.vmem [shape: bf16[128,10], index: 4, kind: input, shape index: {}]   ;;  %s484_s5 = inlined_call_operand.vmem [shape: f32[1,10], index: 5, kind: input, shape index: {}]   ;;  %s485_s6 = inlined_call_operand.hbm [shape: f32[8,10], index: 6, kind: output, shape index: {}]  }
   0x1   :  { %v344_v0 = vld [vmem:[%s481_s2 + $0x8] sm:$0xff]   ;;  %309 = vmatprep.subr.bf16.mxu1 %v382_v1  ;;  %321 = vmatprep.subr.bf16.mxu0 %v382_v1  ;;  %v28_v2 = vld [vmem:[%s480_s1] sm:$0xf]  ;;  %v348_v6 = vld [vmem:[%s483_s4 + $0x10] sm:$0xff]  }
   0x2   :  { %310 = vmatpush3.bf16.msra.mxu1 %v344_v0  ;;  %311 = vmatprep.mubr.msk.bf16.mxu1 %vm383_vm0, %v382_v1  ;;  %v345_v3 = vld [vmem:[%s481_s2] sm:$0xff]   ;;  %v347_v5 = vld [vmem:[%s483_s4 + $0x8] sm:$0xff]  }
   0x3   :  { %315 = vmatprep.subr.bf16.mxu1 %v382_v1  ;;  %v346_v4 = vld [vmem:[%s483_s4] sm:$0xff]   ;;  %337 = vmatprep.mubr.msk.bf16.mxu0 %vm383_vm0, %v382_v1 }
   0x4   :  { %322 = vmatpush3.bf16.msra.mxu0 %v346_v4 }
   0x5   :  { %312 = vmatmul.mubr.msk.bf16.vlgmr.msra.gmra.mrb[0].mxu1 %vm38_vm1, %v28_v2  ;;  %323 = vmatprep.subr.bf16.mxu0 %v382_v1 }
   0x6   :  { %316 = vmatpush3.bf16.msra.mxu1 %v345_v3  ;;  %317 = vmatprep.mubr.msk.bf16.mxu1 %vm383_vm0, %v382_v1 }
   0x8   :  { %324 = vmatpush3.bf16.msra.mxu0 %v347_v5 }
   0x9   :  { %11 = vsyncpa [#allocation3], 0  ;;  %v25_v7 = vld [vmem:[%s479_s0] sm:$0xf]  ;;  %325 = vmatprep.subr.bf16.mxu0 %v382_v1  ;;  %v349_v8 = vld [vmem:[%s483_s4 + $0x18] sm:$0xff]   ;;  %vm252_vm2 = vcmask 80896  }
   0xa   :  { %v350_v9 = vld [vmem:[%s483_s4 + $0x20] sm:$0xff]   ;;  %v351_v10 = vld [vmem:[%s483_s4 + $0x28] sm:$0xff]   ;;  %v352_v11 = vld [vmem:[%s483_s4 + $0x30] sm:$0xff]  }
   0xb   :  { %v353_v12 = vld [vmem:[%s483_s4 + $0x38] sm:$0xff]   ;;  %v286_v18 = vld [vmem:[%s482_s3] ss:$0 sm:$0xff]  ;;  %s384_s3 = smov [#allocation2]  }
   0xc   :  { %326 = vmatpush3.bf16.msra.mxu0 %v348_v6  ;;  %v287_v26 = vld [vmem:[%s484_s5] ss:$0 sm:$0xff]  ;;  %s272_s5 = sshll.u32 %s384_s3, 4  ;;  %s273_s5 = int_to_ptr.vmem [resolvable:$true] %s272_s5 }
   0xd   :  { %318 = vmatmul.mubr.msk.bf16.vlgmr.msra.gmra.mrb[4].mxu1 %vm38_vm1, %v25_v7  ;;  %327 = vmatprep.subr.bf16.mxu0 %v382_v1  ;;  %s358_s21 = scalar_lea.vmem %s273_s5, 128  ;;  %p363_p1 = scmp.lt.s32.totalorder %s273_s5, %s273_s5 }
   0xe   :  { %p359_p0 = scmp.ne.s32.totalorder %s273_s5, %s358_s21  ;;  %p364_p2 = scmp.lt.s32.totalorder %s358_s21, %s358_s21 }
  0x10   :  { %328 = vmatpush3.bf16.msra.mxu0 %v349_v8  ;;  %p365_p3 = por %p364_p2, %p363_p1 }
  0x11   :  { %329 = vmatprep.subr.bf16.mxu0 %v382_v1 }
  0x12   :  { %p366_p4 = pnand %p365_p3, %p359_p0 }
  0x14   :  { %330 = vmatpush3.bf16.msra.mxu0 %v350_v9 }
  0x15   :  { %331 = vmatprep.subr.bf16.mxu0 %v382_v1 }
  0x18   :  { %332 = vmatpush3.bf16.msra.mxu0 %v351_v10 }
  0x19   :  { %333 = vmatprep.subr.bf16.mxu0 %v382_v1 }
  0x1c   :  { %334 = vmatpush3.bf16.msra.mxu0 %v352_v11 }
  0x1d   :  { %335 = vmatprep.subr.bf16.mxu0 %v382_v1 }
  0x20   :  { %336 = vmatpush3.bf16.msra.mxu0 %v353_v12 }
  0xd8   :  { %v76_v13 = vpop.f32.mrb[0].mxu1 }
  0xd9   :  { %v313_v14 = vpop.f32.mrb[1].mxu1 }
  0xda   :  { %v79_v15 = vpop.f32.mrb[2].mxu1 }
  0xdb   :  { %v314_v16 = vpop.f32.mrb[3].mxu1 }
  0xe0   :  { %v125_v17 = vpop.f32.mrb[4].mxu1 }
  0xe1   :  { %v126_v19 = vadd.f32 %v125_v17, %v76_v13  ;;  %v319_v20 = vpop.f32.mrb[5].mxu1 }
  0xe2   :  { %v128_v21 = vpop.f32.mrb[6].mxu1 }
  0xe3   :  { %v138_v22 = vadd.f32 %v286_v18, %v126_v19  ;;  %v320_v23 = vpop.f32.mrb[7].mxu1 }
  0xe5   :  { %v139_v24 = vmax.f32 %v138_v22, 0.0 }
  0xe7   :  { %v140_v25 = vpack.c.bf16 %v139_v24, %v139_v24 }
  0xe9   :  { %338 = vmatmul.mubr.bf16.vlgmr.msra.gmra.mrb[0].mxu0 %v140_v25 }
 0x1bc   :  { %v246_v27 = vpop.f32.mrb[0].mxu0 }
 0x1bd   :  { %v247_v28 = vadd.f32 %v287_v26, %v246_v27  ;;  %v339_v29 = vpop.f32.mrb[1].mxu0 }
 0x1be   :  { %v249_v30 = vpop.f32.mrb[2].mxu0 }
 0x1bf   :  { %v340_v31 = vpop.f32.mrb[3].mxu0  ;;  %v253_v32 = vsel %vm252_vm2, %v247_v28, -inf }
 0x1c0   :  { %254 = vmax.xlane.f32.xlu0 %v253_v32 }
 0x24d   :  { %v255_v33 = vpop.xlane.xlu0 %254 }
 0x24e   :  { %v256_v34 = vsub.f32 %v247_v28, %v255_v33 }
 0x250   :  { %v257_v35 = vmul.f32 1.442695, %v256_v34 }
 0x252   :  { %354 = vpow2.f32 %v257_v35 }
 0x25c   :  { %v355_v36 = vpop.eup %354 }
 0x25d   :  { %v259_v37 = vsel %vm252_vm2, %v355_v36, 0.0 }
 0x25e   :  { %260 = vadd.xlane.f32.xlu0 %v259_v37 }
 0x2eb   :  { %v261_v38 = vpop.xlane.xlu0 %260 }
 0x2ec   :  { %356 = vlog2.f32 %v261_v38 }
 0x2f6   :  { %v357_v39 = vpop.eup %356 }
 0x2f7   :  { %v263_v40 = vmul.f32 0.6931472, %v357_v39 }
 0x2f9   :  { %v264_v41 = vsub.f32 %v256_v34, %v263_v40 }
 0x2fb   :  { %265 = vst.msk [vmem:[#allocation2] sm:$0xff] %vm252_vm2, %v264_v41 }
 0x2fc   :  { %369 = shalt.err (!%p366_p4)
}
 0x2fd   :  { %s370_s24 = scalar_lea.hbm %s485_s6, 128 }
 0x2fe   :  { %p371_p5 = scmp.ne.s32.totalorder %s485_s6, %s370_s24  ;;  %p374_p6 = scmp.lt.u32.totalorder %s370_s24, %s485_s6 }
 0x300   :  { %p376_p7 = pnand %p374_p6, %p371_p5 }
 0x302   :  { %379 = shalt.err (!%p376_p7)
}
 0x303   :  { %275 = dma.vmem_to_hbm [thread:$0]  %s273_s5, 128, %s485_s6, [#allocation3]  }
 0x304   :  { %380 = dma.done.wait [#allocation3], 128  }
 0x305   :  { %381 = vsyncadd [#allocation3], 4294967168 }
 0x306   :  { %279 = vsyncpa [#allocation3], 1 }

</bundles_post_ra>
